<compile_context>
chip_gen: v7x
topology: tpu7x:2x2x1
jax: 0.10.0
libtpu: 0.0.40
codegen_flags: <defaults>
</compile_context>

<pallas_src>
import jax
import jax.numpy as jnp
from jax.experimental import pallas as pl
from jax.experimental.pallas import tpu as pltpu


IN_SIZE = 28 * 28      # 784
HIDDEN_SIZE = 100
OUT_SIZE = 10          # num_classes

HIDDEN_PAD = 128       # pad hidden dim to the 128-lane boundary
OUT_PAD = 128          # lane-dense output block; sliced to 10 in the wrapper

MAX_TILE_B = 2048      # batch tile (sweepable); ~13 MiB double-buffered f32 x tiles
MIN_GRID_STEPS = 4     # keep >= 2 grid steps per TensorCore on v7x when B is large
VMEM_LIMIT_BYTES = 40 * 1024 * 1024   # covers worst-case tiles; < v7x 64 MiB


def _round_up(n, m):
    return ((n + m - 1) // m) * m


def mlp_kernel(x_ref, w1_ref, b1_ref, w2_ref, b2_ref, o_ref):
    # x_ref:  (TB, 784) f32  (cast to bf16 here -> no separate HBM cast pass)
    # w1_ref: (784, 128) bf16   b1_ref: (1, 128) f32
    # w2_ref: (128, 128) bf16   b2_ref: (1, 128) f32
    # o_ref:  (TB, 128) bf16
    x = x_ref[...].astype(jnp.bfloat16)
    # first layer: bf16 MXU matmul, f32 accumulate; bias + ReLU in f32 on the VPU
    h = jnp.dot(x, w1_ref[...], preferred_element_type=jnp.float32)
    h = jnp.maximum(h + b1_ref[...], 0.0)
    # second layer: bf16 into the MXU, f32 accumulate + bias, bf16 store
    y = jnp.dot(h.astype(jnp.bfloat16), w2_ref[...],
                preferred_element_type=jnp.float32)
    o_ref[...] = (y + b2_ref[...]).astype(o_ref.dtype)


def prepare_params(w1, b1, w2, b2):
    """One-time layout prep, hoisted out of the forward path.
    Pads hidden 100->128 and out 10->128 with zeros (lane-dense tiles, numerically
    exact) and casts weights to bf16 (MXU-native); biases stay f32."""
    w1p = jnp.zeros((IN_SIZE, HIDDEN_PAD), jnp.bfloat16)
    w1p = w1p.at[:, :HIDDEN_SIZE].set(w1.astype(jnp.bfloat16))
    b1p = jnp.zeros((1, HIDDEN_PAD), jnp.float32)
    b1p = b1p.at[:, :HIDDEN_SIZE].set(b1.reshape(1, HIDDEN_SIZE))
    w2p = jnp.zeros((HIDDEN_PAD, OUT_PAD), jnp.bfloat16)
    w2p = w2p.at[:HIDDEN_SIZE, :OUT_SIZE].set(w2.astype(jnp.bfloat16))
    b2p = jnp.zeros((1, OUT_PAD), jnp.float32)
    b2p = b2p.at[:, :OUT_SIZE].set(b2.reshape(1, OUT_SIZE))
    return w1p, b1p, w2p, b2p


def _pick_tile(B, max_tile_b):
    """Largest sane batch tile; if B spans several tiles, keep >= MIN_GRID_STEPS
    grid steps so the 'parallel' axis can shard across both v7x TensorCores."""
    TB = min(max_tile_b, _round_up(B, 8))
    if B > TB:
        TB = max(8, min(TB, _round_up(-(-B // MIN_GRID_STEPS), 8)))
    return TB


def mnist_mlp_forward(batch, params, *, max_tile_b=MAX_TILE_B):
    """batch: (B, 1, 28, 28) float32 (NCHW). params: prepare_params(...) output.
    Returns squeeze((B, 10)) float32."""
    w1p, b1p, w2p, b2p = params
    B = batch.shape[0]

    # reshape is a view (contiguous); NO dtype cast here - it happens in-kernel
    x2d = batch.reshape(B, -1)                                   # (B, 784) f32

    TB = _pick_tile(B, max_tile_b)
    grid = (pl.cdiv(B, TB),)   # partial last block OK: rows are independent

    cost = pl.CostEstimate(
        flops=2 * B * (IN_SIZE * HIDDEN_PAD + HIDDEN_PAD * OUT_PAD),
        transcendentals=0,
        bytes_accessed=(B * IN_SIZE * 4            # x (f32)
                        + IN_SIZE * HIDDEN_PAD * 2 # w1 (bf16)
                        + HIDDEN_PAD * 4           # b1 (f32)
                        + HIDDEN_PAD * OUT_PAD * 2 # w2 (bf16)
                        + OUT_PAD * 4              # b2 (f32)
                        + B * OUT_PAD * 2),        # out (bf16)
    )

    out = pl.pallas_call(
        mlp_kernel,
        out_shape=jax.ShapeDtypeStruct((B, OUT_PAD), jnp.bfloat16),
        grid_spec=pl.GridSpec(
            grid=grid,
            in_specs=[
                # activation tiles march down the batch axis (double-buffered)
                pl.BlockSpec((TB, IN_SIZE), lambda i: (i, 0)),
                # weights / biases: constant block index -> stay VMEM-resident
                pl.BlockSpec((IN_SIZE, HIDDEN_PAD), lambda i: (0, 0)),
                pl.BlockSpec((1, HIDDEN_PAD), lambda i: (0, 0)),
                pl.BlockSpec((HIDDEN_PAD, OUT_PAD), lambda i: (0, 0)),
                pl.BlockSpec((1, OUT_PAD), lambda i: (0, 0)),
            ],
            out_specs=pl.BlockSpec((TB, OUT_PAD), lambda i: (i, 0)),
        ),
        compiler_params=pltpu.CompilerParams(
            dimension_semantics=("parallel",),     # shard batch across TCs (v7x)
            vmem_limit_bytes=VMEM_LIMIT_BYTES,
        ),
        cost_estimate=cost,
    )(x2d, w1p, b1p, w2p, b2p)

    out = out[:, :OUT_SIZE].astype(jnp.float32)    # drop lane padding, back to f32
    # torch.squeeze: drop all size-1 dims (e.g. if B == 1 -> shape (10,))
    return jnp.squeeze(out)


def init_params(key):
    """Deterministic init matching the module's shapes.
    Weights: Xavier-normal (std = sqrt(2/(fan_in+fan_out))), as in __init__.
    Biases:  PyTorch Linear default U(-1/sqrt(fan_in), 1/sqrt(fan_in)).
    Stored as (in, out) so the kernel does x @ W."""
    k1, k2, k3, k4 = jax.random.split(key, 4)
    std1 = (2.0 / (IN_SIZE + HIDDEN_SIZE)) ** 0.5
    std2 = (2.0 / (HIDDEN_SIZE + OUT_SIZE)) ** 0.5
    w1 = std1 * jax.random.normal(k1, (IN_SIZE, HIDDEN_SIZE), jnp.float32)
    w2 = std2 * jax.random.normal(k2, (HIDDEN_SIZE, OUT_SIZE), jnp.float32)
    bnd1 = 1.0 / (IN_SIZE ** 0.5)
    bnd2 = 1.0 / (HIDDEN_SIZE ** 0.5)
    b1 = jax.random.uniform(k3, (HIDDEN_SIZE,), jnp.float32, -bnd1, bnd1)
    b2 = jax.random.uniform(k4, (OUT_SIZE,), jnp.float32, -bnd2, bnd2)
    return w1, b1, w2, b2


if __name__ == "__main__":
    key = jax.random.PRNGKey(0)
    k_params, k_x = jax.random.split(key)
    w1, b1, w2, b2 = init_params(k_params)
    params = prepare_params(w1, b1, w2, b2)        # hoisted: done once, not per call

    B = 2
    batch = jax.random.normal(k_x, (B, 1, 28, 28), jnp.float32)   # NCHW MNIST-like

    out = mnist_mlp_forward(batch, params)
    out = jax.block_until_ready(out)
    assert out.shape == (B, OUT_SIZE)

    # reference in plain JAX using the same recipe (bf16 matmul, f32 accumulate,
    # bf16 final store) so the comparison is tight
    x2d = batch.reshape(B, -1)
    h_ref = jnp.maximum(
        jnp.dot(x2d.astype(jnp.bfloat16), w1.astype(jnp.bfloat16),
                preferred_element_type=jnp.float32) + b1, 0.0)
    ref = jnp.dot(h_ref.astype(jnp.bfloat16), w2.astype(jnp.bfloat16),
                  preferred_element_type=jnp.float32) + b2
    ref = jnp.squeeze(ref.astype(jnp.bfloat16).astype(jnp.float32))
    assert jnp.allclose(out, ref, atol=2e-2, rtol=2e-2)

    # looser sanity check against a pure-f32 reference (bf16 matmul/store error bound)
    ref_f32 = jnp.squeeze(jnp.maximum(x2d @ w1 + b1, 0.0) @ w2 + b2)
    assert jnp.allclose(out, ref_f32, atol=1e-1, rtol=1e-1)

    print("KERNEL_OK")
</pallas_src>

<mosaic_0001>
module attributes {stable_mosaic.version = 11 : i64} {
  func.func @mlp_kernel(%arg0: i32, %arg1: memref<8x784xf32, #tpu.memory_space<vmem>>, %arg2: memref<784x128xbf16, #tpu.memory_space<vmem>>, %arg3: memref<1x128xf32, #tpu.memory_space<vmem>>, %arg4: memref<128x128xbf16, #tpu.memory_space<vmem>>, %arg5: memref<1x128xf32, #tpu.memory_space<vmem>>, %arg6: memref<8x128xbf16, #tpu.memory_space<vmem>>) attributes {dimension_semantics = [#tpu.dimension_semantics<parallel>], iteration_bounds = array<i64: 1>, scalar_prefetch = 0 : i64, scratch_operands = 0 : i64, tpu.core_type = #tpu.core_type<tc>, window_params = [{transform_indices = @transform_0, window_bounds = array<i64: 8, 784>}, {pipeline_mode = #tpu.pipeline_mode<synchronous>, transform_indices = @transform_1, window_bounds = array<i64: 784, 128>}, {pipeline_mode = #tpu.pipeline_mode<synchronous>, transform_indices = @transform_2, window_bounds = array<i64: 1, 128>}, {pipeline_mode = #tpu.pipeline_mode<synchronous>, transform_indices = @transform_3, window_bounds = array<i64: 128, 128>}, {pipeline_mode = #tpu.pipeline_mode<synchronous>, transform_indices = @transform_4, window_bounds = array<i64: 1, 128>}, {transform_indices = @transform_5, window_bounds = array<i64: 8, 128>}]} {
    %c0 = arith.constant 0 : index
    %c0_0 = arith.constant 0 : index
    %0 = vector.load %arg1[%c0, %c0_0] : memref<8x784xf32, #tpu.memory_space<vmem>>, vector<8x784xf32>
    %1 = arith.truncf %0 : vector<8x784xf32> to vector<8x784xbf16>
    %c0_1 = arith.constant 0 : index
    %c0_2 = arith.constant 0 : index
    %2 = vector.load %arg2[%c0_1, %c0_2] : memref<784x128xbf16, #tpu.memory_space<vmem>>, vector<784x128xbf16>
    %cst = arith.constant dense<0.000000e+00> : vector<8x128xf32>
    %3 = tpu.matmul %1, %2, %cst {dimension_numbers = #tpu.dot_dimension_numbers<[1], [0], [0], [1], [0, 0, 1, 1], [], []>} : vector<8x784xbf16>, vector<784x128xbf16>, vector<8x128xf32> -> vector<8x128xf32>
    %c0_3 = arith.constant 0 : index
    %c0_4 = arith.constant 0 : index
    %4 = vector.load %arg3[%c0_3, %c0_4] : memref<1x128xf32, #tpu.memory_space<vmem>>, vector<1x128xf32>
    %5 = vector.broadcast %4 : vector<1x128xf32> to vector<8x128xf32>
    %6 = arith.addf %3, %5 : vector<8x128xf32>
    %cst_5 = arith.constant 0.000000e+00 : f32
    %7 = vector.broadcast %cst_5 : f32 to vector<8x128xf32>
    %8 = arith.maximumf %6, %7 : vector<8x128xf32>
    %9 = arith.truncf %8 : vector<8x128xf32> to vector<8x128xbf16>
    %c0_6 = arith.constant 0 : index
    %c0_7 = arith.constant 0 : index
    %10 = vector.load %arg4[%c0_6, %c0_7] : memref<128x128xbf16, #tpu.memory_space<vmem>>, vector<128x128xbf16>
    %cst_8 = arith.constant dense<0.000000e+00> : vector<8x128xf32>
    %11 = tpu.matmul %9, %10, %cst_8 {dimension_numbers = #tpu.dot_dimension_numbers<[1], [0], [0], [1], [0, 0, 1, 1], [], []>} : vector<8x128xbf16>, vector<128x128xbf16>, vector<8x128xf32> -> vector<8x128xf32>
    %c0_9 = arith.constant 0 : index
    %c0_10 = arith.constant 0 : index
    %12 = vector.load %arg5[%c0_9, %c0_10] : memref<1x128xf32, #tpu.memory_space<vmem>>, vector<1x128xf32>
    %13 = vector.broadcast %12 : vector<1x128xf32> to vector<8x128xf32>
    %14 = arith.addf %11, %13 : vector<8x128xf32>
    %15 = arith.truncf %14 : vector<8x128xf32> to vector<8x128xbf16>
    %c0_11 = arith.constant 0 : index
    %c0_12 = arith.constant 0 : index
    %16 = vector.load %arg6[%c0_11, %c0_12] : memref<8x128xbf16, #tpu.memory_space<vmem>>, vector<8x128xbf16>
    tpu.vector_store %arg6[%c0_11, %c0_12], %15 {strides = array<i32>} : memref<8x128xbf16, #tpu.memory_space<vmem>>, vector<8x128xbf16>,
    return
  }
  func.func @transform_0(%arg0: i32) -> (i32, i32) {
    %c0_i32 = arith.constant 0 : i32
    %c0_i32_0 = arith.constant 0 : i32
    return %arg0, %c0_i32 : i32, i32
  }
  func.func @transform_1(%arg0: i32) -> (i32, i32) {
    %c0_i32 = arith.constant 0 : i32
    %c0_i32_0 = arith.constant 0 : i32
    %c0_i32_1 = arith.constant 0 : i32
    return %c0_i32, %c0_i32_0 : i32, i32
  }
  func.func @transform_2(%arg0: i32) -> (i32, i32) {
    %c0_i32 = arith.constant 0 : i32
    %c0_i32_0 = arith.constant 0 : i32
    %c0_i32_1 = arith.constant 0 : i32
    return %c0_i32, %c0_i32_0 : i32, i32
  }
  func.func @transform_3(%arg0: i32) -> (i32, i32) {
    %c0_i32 = arith.constant 0 : i32
    %c0_i32_0 = arith.constant 0 : i32
    %c0_i32_1 = arith.constant 0 : i32
    return %c0_i32, %c0_i32_0 : i32, i32
  }
  func.func @transform_4(%arg0: i32) -> (i32, i32) {
    %c0_i32 = arith.constant 0 : i32
    %c0_i32_0 = arith.constant 0 : i32
    %c0_i32_1 = arith.constant 0 : i32
    return %c0_i32, %c0_i32_0 : i32, i32
  }
  func.func @transform_5(%arg0: i32) -> (i32, i32) {
    %c0_i32 = arith.constant 0 : i32
    %c0_i32_0 = arith.constant 0 : i32
    return %arg0, %c0_i32 : i32, i32
  }
}

</mosaic_0001>

<bundles_post_ra>
// kernel: tpu_custom_call.1
= control target key start
LH: loop header
LB: loop body
LE: loop exit
PB: predicated region body
PF: predicated region fallthrough
CT: control target
= control target key end

     0   :  { %10 = vsyncpa [#allocation3], 0  ;;  %s1365_s0 = inlined_call_operand.hbm [shape: f32[2,784], index: 0, kind: input, shape index: {}]   ;;  %s1366_s1 = inlined_call_operand.hbm [shape: bf16[784,128], index: 1, kind: input, shape index: {}]   ;;  %s1367_s2 = inlined_call_operand.vmem [shape: f32[1,128], index: 2, kind: input, shape index: {}]   ;;  %s1368_s3 = inlined_call_operand.hbm [shape: bf16[128,128], index: 3, kind: input, shape index: {}]   ;;  %s1369_s4 = inlined_call_operand.vmem [shape: f32[1,128], index: 4, kind: input, shape index: {}]   ;;  %s1370_s5 = inlined_call_operand.hbm [shape: bf16[2,128], index: 5, kind: output, shape index: {}]  }
   0x1   :  { %11 = vsyncpa [#allocation6], 0 }
   0x2   :  { %12 = vsyncpa [#allocation4], 0 }
   0x3   :  { %17 = vsyncadd [#allocation3], 672  ;;  %s1234_s18 = smov [#allocation5]   ;;  %s1140_s22 = scalar_lea.hbm %s1366_s1, 6272 }
   0x4   :  { %s30_s19 = sshll.u32 %s1234_s18, 4  ;;  %p1141_p0 = scmp.ne.s32.totalorder %s1366_s1, %s1140_s22  ;;  %s31_s19 = int_to_ptr.vmem [resolvable:$true] %s30_s19 }
   0x5   :  { %p1144_p1 = scmp.lt.u32.totalorder %s1140_s22, %s1366_s1 }
   0x7   :  { %p1146_p2 = pnand %p1144_p1, %p1141_p0 }
   0x9   :  { %1149 = shalt.err (!%p1146_p2)
}
   0xa   :  { %s1150_s27 = scalar_lea.vmem %s31_s19, 6272  ;;  %p1155_p4 = scmp.lt.s32.totalorder %s31_s19, %s31_s19 }
   0xb   :  { %p1151_p3 = scmp.ne.s32.totalorder %s31_s19, %s1150_s27  ;;  %p1156_p5 = scmp.lt.s32.totalorder %s1150_s27, %s1150_s27 }
   0xd   :  { %p1157_p6 = por %p1156_p5, %p1155_p4 }
   0xf   :  { %p1158_p7 = pnand %p1157_p6, %p1151_p3 }
  0x11   :  { %1161 = shalt.err (!%p1158_p7)
}
  0x12   :  { %s1235_s28 = smov 64   ;;  %s1236_s29 = smov 4  }
  0x13   :  { %36 = dma.hbm_to_vmem [thread:$0]  %s1366_s1, 6272, %s31_s19, [#allocation6], %s1235_s28, %s1235_s28, %s1236_s29  }
  0x14   :  { %s1237_s7 = smov [#allocation2]   ;;  %s1162_s11 = scalar_lea.hbm %s1365_s0, 224 }
  0x15   :  { %s18_s8 = sshll.u32 %s1237_s7, 4  ;;  %p1163_p8 = scmp.ne.s32.totalorder %s1365_s0, %s1162_s11  ;;  %s19_s8 = int_to_ptr.vmem [resolvable:$true] %s18_s8 }
  0x16   :  { %p1166_p9 = scmp.lt.u32.totalorder %s1162_s11, %s1365_s0 }
  0x18   :  { %p1168_p10 = pnand %p1166_p9, %p1163_p8 }
  0x1a   :  { %1171 = shalt.err (!%p1168_p10)
}
  0x1b   :  { %s1172_s16 = scalar_lea.vmem %s19_s8, 224  ;;  %s1176_s1 = scalar_lea.vmem %s19_s8, 896 }
  0x1c   :  { %p1173_p11 = scmp.ne.s32.totalorder %s19_s8, %s1172_s16  ;;  %p1177_p12 = scmp.lt.s32.totalorder %s19_s8, %s19_s8 }
  0x1d   :  { %p1178_p13 = scmp.lt.s32.totalorder %s1176_s1, %s1172_s16 }
  0x1f   :  { %p1179_p0 = por %p1178_p13, %p1177_p12 }
  0x21   :  { %p1180_p1 = pnand %p1179_p0, %p1173_p11 }
  0x23   :  { %1183 = shalt.err (!%p1180_p1)
}
  0x24   :  { %s1238_s17 = smov 224   ;;  %s1239_s18 = smov 14  }
  0x25   :  { %24 = dma.hbm_to_vmem [thread:$0]  %s1365_s0, 224, %s19_s8, [#allocation3], %s1238_s17, %s1238_s17, %s1239_s18  }
  0x26   :  { %s1240_s21 = smov [#allocation7]   ;;  %s1184_s25 = scalar_lea.hbm %s1368_s3, 1024 }
  0x27   :  { %s44_s22 = sshll.u32 %s1240_s21, 4  ;;  %p1185_p2 = scmp.ne.s32.totalorder %s1368_s3, %s1184_s25  ;;  %s45_s22 = int_to_ptr.vmem [resolvable:$true] %s44_s22 }
  0x28   :  { %p1188_p3 = scmp.lt.u32.totalorder %s1184_s25, %s1368_s3 }
  0x2a   :  { %p1190_p4 = pnand %p1188_p3, %p1185_p2 }
  0x2c   :  { %1193 = shalt.err (!%p1190_p4)
}
  0x2d   :  { %s1194_s7 = scalar_lea.vmem %s45_s22, 1024  ;;  %p1199_p6 = scmp.lt.s32.totalorder %s45_s22, %s45_s22 }
  0x2e   :  { %p1195_p5 = scmp.ne.s32.totalorder %s45_s22, %s1194_s7  ;;  %p1200_p7 = scmp.lt.s32.totalorder %s1194_s7, %s1194_s7 }
  0x30   :  { %p1201_p8 = por %p1200_p7, %p1199_p6 }
  0x32   :  { %p1202_p9 = pnand %p1201_p8, %p1195_p5 }
  0x34   :  { %1205 = shalt.err (!%p1202_p9)
}
  0x35   :  { %50 = dma.hbm_to_vmem [thread:$0]  %s1368_s3, 1024, %s45_s22, [#allocation6], %s1235_s28, %s1235_s28, %s1236_s29  }
  0x36   :  { %1228 = dma.done.wait [#allocation3], 896  }
  0x37   :  { %1229 = vsyncadd [#allocation3], 4294966400 }
  0x38   :  { %1230 = dma.done.wait [#allocation6], 7296  }
  0x39   :  { %1231 = vsyncadd [#allocation6], 4294960000  ;;  %v1071_v0 = vld [vmem:[#allocation5 + $0x40] sm:$0xff]   ;;  %v1075_v4 = vld [vmem:[#allocation5 + $0x48] sm:$0xff]   ;;  %v1241_v23 = vmov 1983009808   ;;  %v86_v25 = vlaneseq }
  0x3a   :  { %v1072_v1 = vld [vmem:[#allocation5] sm:$0xff]   ;;  %954 = vmatprep.subr.bf16.mxu0 %v1071_v0  ;;  %v1076_v5 = vld [vmem:[#allocation5 + $0x8] sm:$0xff]   ;;  %v1079_v8 = vld [vmem:[#allocation5 + $0x50] sm:$0xff]   ;;  %v84_v24 = vunpack.c.l.s4 %v1241_v23  ;;  %v1242_v47 = vmov 0.0   ;;  %vm1243_vm0 = vmmov 0   ;;  %vm563_vm1 = vcmask 130048  }
  0x3b   :  { %v1073_v2 = vld [vmem:[#allocation5 + $0xc0] sm:$0xff]   ;;  %955 = vmatpush3.bf16.msra.mxu0 %v1072_v1  ;;  %v1077_v6 = vld [vmem:[#allocation5 + $0xc8] sm:$0xff]   ;;  %v1080_v9 = vld [vmem:[#allocation5 + $0x10] sm:$0xff]   ;;  %v1320_v31 = vshrl.u32 %v86_v25, 7 }
  0x3c   :  { %v1074_v3 = vld [vmem:[#allocation5 + $0x80] sm:$0xff]   ;;  %976 = vmatprep.subr.bf16.mxu1 %v1073_v2  ;;  %956 = vmatprep.subr.bf16.mxu0 %v1075_v4  ;;  %v1078_v7 = vld [vmem:[#allocation5 + $0x88] sm:$0xff]   ;;  %v1081_v10 = vld [vmem:[#allocation5 + $0xd0] sm:$0xff]   ;;  %v85_v30 = vunpack.c.0.s8 %v84_v24 }
  0x3d   :  { %977 = vmatpush3.bf16.msra.mxu1 %v1074_v3  ;;  %v1082_v11 = vld [vmem:[#allocation5 + $0x90] sm:$0xff]   ;;  %v1083_v12 = vld [vmem:[#allocation5 + $0x58] sm:$0xff]   ;;  %v1087_v16 = vld [vmem:[#allocation5 + $0x60] sm:$0xff]  }
  0x3e   :  { %978 = vmatprep.subr.bf16.mxu1 %v1077_v6  ;;  %v1084_v13 = vld [vmem:[#allocation5 + $0x18] sm:$0xff]   ;;  %v1088_v17 = vld [vmem:[#allocation5 + $0x20] sm:$0xff]   ;;  %v1091_v20 = vld [vmem:[#allocation5 + $0x68] sm:$0xff]   ;;  %v1323_v36 = vsub.s32 %v85_v30, %v1320_v31 }
  0x3f   :  { %957 = vmatpush3.bf16.msra.mxu0 %v1076_v5  ;;  %v1085_v14 = vld [vmem:[#allocation5 + $0xd8] sm:$0xff]   ;;  %v1089_v18 = vld [vmem:[#allocation5 + $0xe0] sm:$0xff]   ;;  %v1092_v21 = vld [vmem:[#allocation5 + $0x28] sm:$0xff]  }
  0x40   :  { %958 = vmatprep.subr.bf16.mxu0 %v1079_v8  ;;  %v1086_v15 = vld [vmem:[#allocation5 + $0x98] sm:$0xff]   ;;  %v1090_v19 = vld [vmem:[#allocation5 + $0xa0] sm:$0xff]   ;;  %v1093_v22 = vld [vmem:[#allocation5 + $0xe8] sm:$0xff]  }
  0x41   :  { %979 = vmatpush3.bf16.msra.mxu1 %v1078_v7  ;;  %v1094_v26 = vld [vmem:[#allocation5 + $0xa8] sm:$0xff]   ;;  %v1095_v27 = vld [vmem:[#allocation5 + $0x70] sm:$0xff]   ;;  %v1099_v33 = vld [vmem:[#allocation5 + $0x78] sm:$0xff]  }
  0x42   :  { %980 = vmatprep.subr.bf16.mxu1 %v1081_v10  ;;  %v1096_v28 = vld [vmem:[#allocation5 + $0x30] sm:$0xff]   ;;  %v1100_v34 = vld [vmem:[#allocation5 + $0x38] sm:$0xff]   ;;  %v1107_v42 = vld [vmem:[#allocation5 + $0x140] sm:$0xff]  }
  0x43   :  { %959 = vmatpush3.bf16.msra.mxu0 %v1080_v9  ;;  %v1097_v29 = vld [vmem:[#allocation5 + $0xf0] sm:$0xff]   ;;  %v1101_v35 = vld [vmem:[#allocation5 + $0xf8] sm:$0xff]   ;;  %v1110_v52 = vld [vmem:[#allocation5 + $0x100] sm:$0xff]  }
  0x44   :  { %960 = vmatprep.subr.bf16.mxu0 %v1083_v12  ;;  %v1098_v32 = vld [vmem:[#allocation5 + $0xb0] sm:$0xff]   ;;  %v1106_v39 = vld [vmem:[#allocation5 + $0xb8] sm:$0xff]   ;;  %v1111_v55 = vld [vmem:[#allocation5 + $0x148] sm:$0xff]  }
  0x45   :  { %981 = vmatpush3.bf16.msra.mxu1 %v1082_v11  ;;  %v1102_v37 = vld [vmem:[#allocation2] ss:$14 sps:$4 sm:$0xff]   ;;  %v1104_v38 = vld [vmem:[#allocation2 + $0x1c] ss:$14 sps:$4 sm:$0xff]   ;;  %v1108_v43 = vld [vmem:[#allocation2 + $0x4] ss:$14 sps:$4 sm:$0xff]  }
  0x46   :  { %982 = vmatprep.subr.bf16.mxu1 %v1085_v14  ;;  %v89_v40 = vrot.slane %v1102_v37, %v1323_v36  ;;  %v103_v41 = vrot.slane %v1104_v38, %v1323_v36  ;;  %v1109_v44 = vld [vmem:[#allocation2 + $0x20] ss:$14 sps:$4 sm:$0xff]   ;;  %v96_v48 = vrot.slane %v1108_v43, %v1323_v36  ;;  %v1117_v63 = vld [vmem:[#allocation5 + $0x160] sm:$0xff]   ;;  %v1129_v5 = vld [vmem:[#allocation2 + $0x24] ss:$14 sps:$4 sm:$0xff]  }
  0x47   :  { %961 = vmatpush3.bf16.msra.mxu0 %v1084_v13  ;;  %v110_v49 = vrot.slane %v1109_v44, %v1323_v36  ;;  %v1112_v58 = vld [vmem:[#allocation5 + $0x108] sm:$0xff]   ;;  %v1113_v59 = vld [vmem:[#allocation5 + $0x150] sm:$0xff]   ;;  %v1115_v61 = vld [vmem:[#allocation5 + $0x158] sm:$0xff]   ;;  %v139_v10 = vrot.slane %v1129_v5, %v1323_v36 }
  0x48   :  { %962 = vmatprep.subr.bf16.mxu0 %v1087_v16  ;;  %v112_v45 = vcombine.high %v89_v40, %v103_v41  ;;  %v111_v46 = vcombine.low %v89_v40, %v103_v41  ;;  %v1114_v60 = vld [vmem:[#allocation5 + $0x110] sm:$0xff]   ;;  %v1116_v62 = vld [vmem:[#allocation5 + $0x118] sm:$0xff]   ;;  %v1125_v0 = vld [vmem:[#allocation5 + $0x180] sm:$0xff]  }
  0x49   :  { %983 = vmatpush3.bf16.msra.mxu1 %v1086_v15  ;;  %v114_v53 = vcombine.high %v96_v48, %v110_v49  ;;  %v113_v54 = vcombine.low %v96_v48, %v110_v49  ;;  %v1118_v1 = vld [vmem:[#allocation5 + $0x120] sm:$0xff]   ;;  %v1119_v4 = vld [vmem:[#allocation5 + $0x168] sm:$0xff]   ;;  %v1131_v6 = vld [vmem:[#allocation2 + $0x28] ss:$14 sps:$4 sm:$0x33]  }
  0x4a   :  { %984 = vmatprep.subr.bf16.mxu1 %v1089_v18  ;;  %v158_v50 = vpack.c.bf16 %v112_v45, %v112_v45  ;;  %v157_v51 = vpack.c.bf16 %v111_v46, %v111_v46  ;;  %v1126_v2 = vld [vmem:[#allocation2 + $0x8] ss:$14 sps:$4 sm:$0xff]   ;;  %v1128_v3 = vld [vmem:[#allocation2 + $0xc] ss:$14 sps:$4 sm:$0x33]   ;;  %v1120_v9 = vld [vmem:[#allocation5 + $0x128] sm:$0xff]   ;;  %v146_v11 = vrot.slane %v1131_v6, %v1323_v36 }
  0x4b   :  { %963 = vmatpush3.bf16.msra.mxu0 %v1088_v17  ;;  %v160_v56 = vpack.c.bf16 %v114_v53, %v114_v53  ;;  %v159_v57 = vpack.c.bf16 %v113_v54, %v113_v54  ;;  %v125_v7 = vrot.slane %v1126_v2, %v1323_v36  ;;  %v132_v8 = vrot.slane %v1128_v3, %v1323_v36  ;;  %v1121_v12 = vld [vmem:[#allocation5 + $0x170] sm:$0xff]   ;;  %v1123_v18 = vld [vmem:[#allocation5 + $0x178] sm:$0xff]   ;;  %v1135_v25 = vld [vmem:[#allocation7 + $0x18] sm:$0xff]  }
  0x4c   :  { %964 = vmatprep.subr.bf16.mxu0 %v1091_v20  ;;  %599 = vmatprep.mubr.bf16.mxu0 %v158_v50  ;;  %v1122_v17 = vld [vmem:[#allocation5 + $0x130] sm:$0xff]   ;;  %v1124_v20 = vld [vmem:[#allocation5 + $0x138] sm:$0xff]  }
  0x4d   :  { %985 = vmatpush3.bf16.msra.mxu1 %v1090_v19  ;;  %639 = vmatprep.mubr.bf16.mxu1 %v160_v56  ;;  %v148_v13 = vcombine.high %v125_v7, %v139_v10  ;;  %v149_v14 = vcombine.low %v132_v8, %v146_v11  ;;  %v147_v19 = vcombine.low %v125_v7, %v139_v10  ;;  %v1133_v23 = vld [vmem:[#allocation7 + $0x8] sm:$0xff]   ;;  %v1134_v24 = vld [vmem:[#allocation7 + $0x10] sm:$0xff]  }
  0x4e   :  { %986 = vmatprep.subr.bf16.mxu1 %v1093_v22  ;;  %v1132_v22 = vld [vmem:[#allocation7] sm:$0xff]  }
  0x4f   :  { %965 = vmatpush3.bf16.msra.mxu0 %v1092_v21  ;;  %v162_v15 = vpack.c.bf16 %v148_v13, %v148_v13  ;;  %v163_v16 = vpack.c.bf16 %v149_v14, %v149_v14  ;;  %v161_v21 = vpack.c.bf16 %v147_v19, %v147_v19 }
  0x50   :  { %966 = vmatprep.subr.bf16.mxu0 %v1095_v27  ;;  %v1137_v27 = vld [vmem:[#allocation7 + $0x28] sm:$0xff]  }
  0x51   :  { %987 = vmatpush3.bf16.msra.mxu1 %v1094_v26  ;;  %v1136_v26 = vld [vmem:[#allocation7 + $0x20] sm:$0xff]  }
  0x52   :  { %988 = vmatprep.subr.bf16.mxu1 %v1097_v29  ;;  %v1139_v29 = vld [vmem:[#allocation7 + $0x38] sm:$0xff]  }
  0x53   :  { %967 = vmatpush3.bf16.msra.mxu0 %v1096_v28  ;;  %v1138_v28 = vld [vmem:[#allocation7 + $0x30] sm:$0xff]  }
  0x54   :  { %968 = vmatprep.subr.bf16.mxu0 %v1099_v33 }
  0x55   :  { %989 = vmatpush3.bf16.msra.mxu1 %v1098_v32  ;;  %v892_v32 = vld [vmem:[%s1367_s2] ss:$0 sm:$0xff] }
  0x56   :  { %990 = vmatprep.subr.bf16.mxu1 %v1101_v35 }
  0x57   :  { %969 = vmatpush3.bf16.msra.mxu0 %v1100_v34 }
  0x58   :  { %998 = vmatprep.subr.bf16.mxu0 %v1107_v42 }
  0x59   :  { %991 = vmatpush3.bf16.msra.mxu1 %v1106_v39 }
  0x5a   :  { %1031 = vmatprep.subr.bf16.mxu1 %v1242_v47  ;;  %600 = vmatmul.mubr.bf16.vlgmr.msra.gmra.mrb[0].mxu0 %v157_v51 }
  0x5b   :  { %999 = vmatpush3.bf16.msra.mxu0 %v1110_v52  ;;  %679 = vmatprep.mubr.bf16.mxu0 %v162_v15 }
  0x5c   :  { %1000 = vmatprep.subr.bf16.mxu0 %v1111_v55  ;;  %640 = vmatmul.mubr.bf16.vlgmr.msra.gmra.mrb[0].mxu1 %v159_v57  ;;  %v1244_v57 = vmov 1966171168  }
  0x5d   :  { %1033 = vmatprep.mubr.msk.bf16.mxu1 %vm1243_vm0, %v1242_v47  ;;  %1032 = vmatpush3.bf16.msra.mxu1 %v1125_v0 }
  0x5e   :  { %1037 = vmatprep.subr.bf16.mxu1 %v1242_v47 }
  0x5f   :  { %1001 = vmatpush3.bf16.msra.mxu0 %v1112_v58  ;;  %v843_v58 = vunpack.c.l.s4 %v1244_v57 }
  0x60   :  { %1002 = vmatprep.subr.bf16.mxu0 %v1113_v59 }
  0x61   :  { %v844_v59 = vunpack.c.0.s8 %v843_v58 }
  0x63   :  { %1003 = vmatpush3.bf16.msra.mxu0 %v1114_v60  ;;  %v943_v60 = vld [vmem:[%s1369_s4] ss:$0 sm:$0xff] }
  0x64   :  { %1004 = vmatprep.subr.bf16.mxu0 %v1115_v61  ;;  %1034 = vmatmul.mubr.msk.bf16.vlgmr.msra.gmra.mrb[4].mxu1 %vm563_vm1, %v163_v16 }
  0x65   :  { %1053 = vmatprep.mubr.msk.bf16.mxu1 %vm1243_vm0, %v1242_v47  ;;  %1038 = vmatpush3.bf16.msra.mxu1 %v1132_v22 }
  0x66   :  { %1039 = vmatprep.subr.bf16.mxu1 %v1242_v47 }
  0x67   :  { %1005 = vmatpush3.bf16.msra.mxu0 %v1116_v62 }
  0x68   :  { %1006 = vmatprep.subr.bf16.mxu0 %v1117_v63  ;;  %v847_v63 = vsub.s32 %v844_v59, %v1320_v31 }
  0x69   :  { %1040 = vmatpush3.bf16.msra.mxu1 %v1133_v23 }
  0x6a   :  { %1041 = vmatprep.subr.bf16.mxu1 %v1242_v47 }
  0x6b   :  { %1007 = vmatpush3.bf16.msra.mxu0 %v1118_v1 }
  0x6c   :  { %1008 = vmatprep.subr.bf16.mxu0 %v1119_v4 }
  0x6d   :  { %1042 = vmatpush3.bf16.msra.mxu1 %v1134_v24 }
  0x6e   :  { %1043 = vmatprep.subr.bf16.mxu1 %v1242_v47 }
  0x6f   :  { %1009 = vmatpush3.bf16.msra.mxu0 %v1120_v9 }
  0x70   :  { %1010 = vmatprep.subr.bf16.mxu0 %v1121_v12 }
  0x71   :  { %1044 = vmatpush3.bf16.msra.mxu1 %v1135_v25 }
  0x72   :  { %1045 = vmatprep.subr.bf16.mxu1 %v1242_v47 }
  0x73   :  { %1011 = vmatpush3.bf16.msra.mxu0 %v1122_v17 }
  0x74   :  { %1012 = vmatprep.subr.bf16.mxu0 %v1123_v18 }
  0x75   :  { %1046 = vmatpush3.bf16.msra.mxu1 %v1136_v26 }
  0x76   :  { %1047 = vmatprep.subr.bf16.mxu1 %v1242_v47 }
  0x77   :  { %1013 = vmatpush3.bf16.msra.mxu0 %v1124_v20 }
  0x79   :  { %1048 = vmatpush3.bf16.msra.mxu1 %v1137_v27 }
  0x7a   :  { %680 = vmatmul.mubr.bf16.vlgmr.msra.gmra.mrb[4].mxu0 %v161_v21  ;;  %1049 = vmatprep.subr.bf16.mxu1 %v1242_v47 }
  0x7d   :  { %1050 = vmatpush3.bf16.msra.mxu1 %v1138_v28 }
  0x7e   :  { %1051 = vmatprep.subr.bf16.mxu1 %v1242_v47 }
  0x81   :  { %1052 = vmatpush3.bf16.msra.mxu1 %v1139_v29 }
 0x12d   :  { %v970_v30 = vpop.f32.mrb[0].mxu0 }
 0x12e   :  { %v971_v33 = vpop.f32.mrb[1].mxu0 }
 0x12f   :  { %v972_v34 = vadd.f32 %v971_v33, %v970_v30  ;;  %v973_v35 = vpop.f32.mrb[2].mxu0  ;;  %v992_v36 = vpop.f32.mrb[0].mxu1 }
 0x130   :  { %v974_v37 = vpop.f32.mrb[3].mxu0  ;;  %v993_v39 = vpop.f32.mrb[1].mxu1 }
 0x131   :  { %v602_v38 = vadd.f32 %v972_v34, %v892_v32  ;;  %v994_v40 = vadd.f32 %v993_v39, %v992_v36  ;;  %v995_v41 = vpop.f32.mrb[2].mxu1 }
 0x132   :  { %v996_v42 = vpop.f32.mrb[3].mxu1 }
 0x133   :  { %v642_v43 = vadd.f32 %v994_v40, %v602_v38 }
 0x137   :  { %v721_v44 = vpop.f32.mrb[4].mxu1 }
 0x138   :  { %v1035_v45 = vpop.f32.mrb[5].mxu1 }
 0x139   :  { %v724_v46 = vpop.f32.mrb[6].mxu1 }
 0x13a   :  { %v1036_v47 = vpop.f32.mrb[7].mxu1 }
 0x14d   :  { %v1014_v48 = vpop.f32.mrb[4].mxu0 }
 0x14e   :  { %v1015_v49 = vpop.f32.mrb[5].mxu0 }
 0x14f   :  { %v1016_v50 = vadd.f32 %v1015_v49, %v1014_v48  ;;  %v1017_v51 = vpop.f32.mrb[6].mxu0 }
 0x150   :  { %v1018_v52 = vpop.f32.mrb[7].mxu0 }
 0x151   :  { %v682_v53 = vadd.f32 %v1016_v50, %v642_v43 }
 0x153   :  { %v722_v54 = vadd.f32 %v721_v44, %v682_v53 }
 0x155   :  { %v727_v55 = vmax.f32 %v722_v54, 0.0 }
 0x157   :  { %v728_v56 = vpack.c.bf16 %v727_v55, %v727_v55 }
 0x159   :  { %1054 = vmatmul.mubr.bf16.vlgmr.msra.gmra.mrb[8].mxu1 %v728_v56 }
 0x22c   :  { %v834_v61 = vpop.f32.mrb[8].mxu1 }
 0x22d   :  { %v835_v62 = vadd.f32 %v943_v60, %v834_v61  ;;  %v1055_v0 = vpop.f32.mrb[9].mxu1 }
 0x22e   :  { %v837_v1 = vpop.f32.mrb[10].mxu1 }
 0x22f   :  { %v840_v2 = vpack.c.bf16 %v835_v62, %v835_v62  ;;  %v1056_v3 = vpop.f32.mrb[11].mxu1 }
 0x231   :  { %v848_v4 = vrot.slane %v840_v2, %v847_v63 }
 0x233   :  { %v849_v5 = vcombine.high %v848_v4, %v848_v4  ;;  %v856_v6 = vrot.slane %v848_v4, %v847_v63  ;;  %952 = vst.sshfl [vmem:[#allocation8] sm:$0x1 pattern:$0x73625140] %v848_v4 }
 0x235   :  { %v863_v7 = vrot.slane %v849_v5, %v847_v63  ;;  %v864_v8 = vcombine.high %v856_v6, %v856_v6  ;;  %953 = vst.sshfl [vmem:[#allocation8 + $0x1] sm:$0x1 pattern:$0x73625140] %v849_v5 }
 0x237   :  { %v865_v9 = vcombine.high %v863_v7, %v863_v7  ;;  %872 = vst [vmem:[#allocation8 + $0x2] sm:$0x1] %v864_v8 }
 0x239   :  { %873 = vst [vmem:[#allocation8 + $0x3] sm:$0x1] %v865_v9 }
 0x23a   :  { %878 = vsyncadd [#allocation4], 48  ;;  %s1245_s4 = smov [#allocation8]  }
 0x23b   :  { %s879_s9 = sshll.u32 %s1245_s4, 4  ;;  %s880_s9 = int_to_ptr.vmem [resolvable:$true] %s879_s9 }
 0x23c   :  { %s1206_s10 = scalar_lea.vmem %s880_s9, 16  ;;  %s1210_s11 = scalar_lea.vmem %s880_s9, 64 }
 0x23d   :  { %p1207_p10 = scmp.ne.s32.totalorder %s880_s9, %s1206_s10  ;;  %p1211_p11 = scmp.lt.s32.totalorder %s880_s9, %s880_s9 }
 0x23e   :  { %p1212_p12 = scmp.lt.s32.totalorder %s1210_s11, %s1206_s10 }
 0x240   :  { %p1213_p13 = por %p1212_p12, %p1211_p11 }
 0x242   :  { %p1214_p0 = pnand %p1213_p13, %p1207_p10 }
 0x244   :  { %1217 = shalt.err (!%p1214_p0)
}
 0x245   :  { %s1218_s14 = scalar_lea.hbm %s1370_s5, 16 }
 0x246   :  { %p1219_p1 = scmp.ne.s32.totalorder %s1370_s5, %s1218_s14  ;;  %p1222_p2 = scmp.lt.u32.totalorder %s1218_s14, %s1370_s5 }
 0x248   :  { %p1224_p3 = pnand %p1222_p2, %p1219_p1 }
 0x24a   :  { %1227 = shalt.err (!%p1224_p3)
}
 0x24b   :  { %s1246_s18 = smov 16   ;;  %s1247_s19 = smov 1  }
 0x24c   :  { %885 = dma.vmem_to_hbm [thread:$0]  %s880_s9, 16, %s1370_s5, [#allocation4], %s1246_s18, %s1246_s18, %s1247_s19  }
 0x24d   :  { %1232 = dma.done.wait [#allocation4], 64  }
 0x24e   :  { %1233 = vsyncadd [#allocation4], 4294967232 }
 0x24f   :  { %889 = vsyncpa [#allocation3], 1 }
 0x250   :  { %890 = vsyncpa [#allocation6], 1 }
 0x251   :  { %891 = vsyncpa [#allocation4], 1 }

</bundles_post_ra>
